<compile_context>
chip_gen: v7x
topology: tpu7x:2x2x1
jax: 0.10.0
libtpu: 0.0.40
codegen_flags: <defaults>
</compile_context>

<pallas_src>
import functools

import jax
import jax.numpy as jnp
from jax.experimental import pallas as pl
from jax.experimental.pallas import tpu as pltpu

EPS = 1e-5  # nn.BatchNorm1d default eps


# ---------------------------------------------------------------------------
# Fused per-node-tile encoder:
#   [BN folded] Linear+ReLU  ->  (linear_x ++ Linear+ReLU) as one dim_emb tile
# ---------------------------------------------------------------------------
def _encoder_core(dim_x, meas_ref, x_ref, w1_ref, b1_ref, w2p_ref, wxp_ref,
                  bcat_ref):
    # pe_encoder layer 1 (BatchNorm affine already folded into w1/b1).
    m = meas_ref[...].astype(jnp.float32)
    h1 = jnp.dot(m, w1_ref[...], preferred_element_type=jnp.float32) + b1_ref[...]
    h1 = jnp.maximum(h1, 0.0)

    # Fused concat: linear_x and pe layer-2 both produce dim_emb-wide results
    # via zero-padded weights; summing them yields [h | pe_preact] directly.
    z = jnp.dot(x_ref[...].astype(jnp.float32), wxp_ref[...],
                preferred_element_type=jnp.float32)
    z = z + jnp.dot(h1, w2p_ref[...], preferred_element_type=jnp.float32)
    z = z + bcat_ref[...]

    # ReLU only on the PE lanes (columns >= dim_x); linear_x lanes pass through.
    col = jax.lax.broadcasted_iota(jnp.int32, z.shape, dimension=1)
    return jnp.where(col >= dim_x, jnp.maximum(z, 0.0), z)


def _encoder_kernel(dim_x, meas_ref, x_ref, w1_ref, b1_ref, w2p_ref, wxp_ref,
                    bcat_ref, out_ref):
    z = _encoder_core(dim_x, meas_ref, x_ref, w1_ref, b1_ref, w2p_ref, wxp_ref,
                      bcat_ref)
    out_ref[...] = z.astype(out_ref.dtype)            # single full-block store


def _encoder_kernel_pe(dim_x, meas_ref, x_ref, w1_ref, b1_ref, w2p_ref,
                       wxp_ref, bcat_ref, out_ref, pe_ref):
    # Fallback used only when x.dtype != float32 so pe stays exact f32.
    z = _encoder_core(dim_x, meas_ref, x_ref, w1_ref, b1_ref, w2p_ref, wxp_ref,
                      bcat_ref)
    out_ref[...] = z.astype(out_ref.dtype)
    pe_ref[...] = z[:, dim_x:].astype(pe_ref.dtype)


# ---------------------------------------------------------------------------
# Wrapper
# ---------------------------------------------------------------------------
def graphlets_node_encoder(x, measure, params, *, dim_emb, dim_pe, tile_m=1024):
    N, dim_in = x.shape
    _, num_metrics = measure.shape
    dim_x = dim_emb - dim_pe
    assert dim_x > 0

    # ---- BatchNorm1d (training-mode batch stats) in XLA, folded into Linear1.
    # Two-pass variance (mean-subtracted) avoids E[x^2]-E[x]^2 cancellation.
    m32 = measure.astype(jnp.float32)
    mean = jnp.mean(m32, axis=0, keepdims=True)
    var = jnp.mean(jnp.square(m32 - mean), axis=0, keepdims=True)  # biased var
    scale = params["gamma"].astype(jnp.float32) * jax.lax.rsqrt(var + EPS)
    shift = params["beta"].astype(jnp.float32) - mean * scale
    w1 = params["w1"].astype(jnp.float32)
    w1f = jnp.reshape(scale, (num_metrics, 1)) * w1          # (num_metrics, 2*dim_pe)
    b1f = shift @ w1 + params["b1"].astype(jnp.float32)       # (1, 2*dim_pe)

    # ---- Zero-pad linear_x / pe-layer-2 weights to dim_emb-wide outputs so the
    # concat happens "for free" inside the kernel with a single output store.
    w2p = jnp.pad(params["w2"].astype(jnp.float32), ((0, 0), (dim_x, 0)))   # (2*dim_pe, dim_emb)
    wxp = jnp.pad(params["wx"].astype(jnp.float32), ((0, 0), (0, dim_pe)))  # (dim_in,   dim_emb)
    bcat = jnp.concatenate([params["bx"].astype(jnp.float32),
                            params["b2"].astype(jnp.float32)], axis=1)      # (1, dim_emb)

    # ---- Node tiling: big tiles (mem-bound), cdiv grid + Pallas tail masking.
    tile_m = int(min(tile_m, ((N + 7) // 8) * 8))   # keep block a multiple of 8
    grid = (pl.cdiv(N, tile_m),)

    def full_spec(arr):
        return pl.BlockSpec(arr.shape, lambda i: (0, 0))

    in_specs = [
        pl.BlockSpec((tile_m, num_metrics), lambda i: (i, 0)),  # measure
        pl.BlockSpec((tile_m, dim_in), lambda i: (i, 0)),       # x
        full_spec(w1f), full_spec(b1f),
        full_spec(w2p), full_spec(wxp), full_spec(bcat),
    ]
    compiler_params = pltpu.CompilerParams(
        dimension_semantics=("parallel",),
        vmem_limit_bytes=32 * 1024 * 1024,
    )
    args = (measure, x, w1f, b1f, w2p, wxp, bcat)

    if x.dtype == jnp.float32:
        out = pl.pallas_call(
            functools.partial(_encoder_kernel, dim_x),
            out_shape=jax.ShapeDtypeStruct((N, dim_emb), x.dtype),
            grid=grid,
            in_specs=in_specs,
            out_specs=pl.BlockSpec((tile_m, dim_emb), lambda i: (i, 0)),
            compiler_params=compiler_params,
        )(*args)
        pe = out[:, dim_x:]              # exact: out is f32, no extra HBM writeback
    else:
        out, pe = pl.pallas_call(
            functools.partial(_encoder_kernel_pe, dim_x),
            out_shape=(jax.ShapeDtypeStruct((N, dim_emb), x.dtype),
                       jax.ShapeDtypeStruct((N, dim_pe), jnp.float32)),
            grid=grid,
            in_specs=in_specs,
            out_specs=(pl.BlockSpec((tile_m, dim_emb), lambda i: (i, 0)),
                       pl.BlockSpec((tile_m, dim_pe), lambda i: (i, 0))),
            compiler_params=compiler_params,
        )(*args)
    return out, pe


# ---------------------------------------------------------------------------
# Pure-JAX reference (mirror of the PyTorch forward) for correctness check.
# ---------------------------------------------------------------------------
def reference(x, measure, p):
    mean = measure.mean(0, keepdims=True)
    var = ((measure - mean) ** 2).mean(0, keepdims=True)
    m = (measure - mean) / jnp.sqrt(var + EPS) * p["gamma"] + p["beta"]
    h1 = jax.nn.relu(m @ p["w1"] + p["b1"])
    pe = jax.nn.relu(h1 @ p["w2"] + p["b2"])
    h = x @ p["wx"] + p["bx"]
    return jnp.concatenate([h, pe], axis=1), pe


if __name__ == "__main__":
    # Small shapes consistent with the module's forward:
    #   N nodes, dim_in raw node features, num_metrics graphlet metrics,
    #   dim_pe positional-encoding dim, dim_emb final embedding dim.
    dim_in = 16
    num_metrics = 8
    dim_pe, dim_emb = 8, 32
    dim_x = dim_emb - dim_pe

    key = jax.random.PRNGKey(0)
    ks = jax.random.split(key, 8)
    params = {
        "gamma": 1.0 + 0.1 * jax.random.normal(ks[0], (1, num_metrics), jnp.float32),
        "beta": 0.1 * jax.random.normal(ks[1], (1, num_metrics), jnp.float32),
        "w1": 0.2 * jax.random.normal(ks[2], (num_metrics, 2 * dim_pe), jnp.float32),
        "b1": 0.1 * jax.random.normal(ks[3], (1, 2 * dim_pe), jnp.float32),
        "w2": 0.2 * jax.random.normal(ks[4], (2 * dim_pe, dim_pe), jnp.float32),
        "b2": 0.1 * jax.random.normal(ks[5], (1, dim_pe), jnp.float32),
        "wx": 0.2 * jax.random.normal(ks[6], (dim_in, dim_x), jnp.float32),
        "bx": 0.1 * jax.random.normal(ks[7], (1, dim_x), jnp.float32),
    }

    def run_case(N, tile_m):
        kx, km = jax.random.split(jax.random.fold_in(key, N))
        x = jax.random.normal(kx, (N, dim_in), jnp.float32)
        measure = jax.random.normal(km, (N, num_metrics), jnp.float32) * 2.0 + 0.5
        out, pe = graphlets_node_encoder(x, measure, params,
                                         dim_emb=dim_emb, dim_pe=dim_pe,
                                         tile_m=tile_m)
        out = jax.block_until_ready(out)
        pe = jax.block_until_ready(pe)
        out_ref, pe_ref = reference(x, measure, params)
        assert out.shape == (N, dim_emb) and pe.shape == (N, dim_pe)
        assert jnp.allclose(out, out_ref, atol=5e-4, rtol=5e-4)
        assert jnp.allclose(pe, pe_ref, atol=5e-4, rtol=5e-4)

    run_case(64, 1024)   # single tile (tile clipped to the node count)
    run_case(200, 64)    # multi-step grid with a masked tail block (200 % 64 != 0)
    print("KERNEL_OK")
</pallas_src>

<mosaic_0001>
module attributes {stable_mosaic.version = 11 : i64} {
  func.func @_encoder_kernel(%arg0: i32, %arg1: memref<64x8xf32, #tpu.memory_space<vmem>>, %arg2: memref<64x16xf32, #tpu.memory_space<vmem>>, %arg3: memref<8x16xf32, #tpu.memory_space<vmem>>, %arg4: memref<1x16xf32, #tpu.memory_space<vmem>>, %arg5: memref<16x32xf32, #tpu.memory_space<vmem>>, %arg6: memref<16x32xf32, #tpu.memory_space<vmem>>, %arg7: memref<1x32xf32, #tpu.memory_space<vmem>>, %arg8: memref<64x32xf32, #tpu.memory_space<vmem>>) attributes {dimension_semantics = [#tpu.dimension_semantics<parallel>], iteration_bounds = array<i64: 1>, scalar_prefetch = 0 : i64, scratch_operands = 0 : i64, tpu.core_type = #tpu.core_type<tc>, window_params = [{transform_indices = @transform_0, window_bounds = array<i64: 64, 8>}, {transform_indices = @transform_1, window_bounds = array<i64: 64, 16>}, {pipeline_mode = #tpu.pipeline_mode<synchronous>, transform_indices = @transform_2, window_bounds = array<i64: 8, 16>}, {pipeline_mode = #tpu.pipeline_mode<synchronous>, transform_indices = @transform_3, window_bounds = array<i64: 1, 16>}, {pipeline_mode = #tpu.pipeline_mode<synchronous>, transform_indices = @transform_4, window_bounds = array<i64: 16, 32>}, {pipeline_mode = #tpu.pipeline_mode<synchronous>, transform_indices = @transform_5, window_bounds = array<i64: 16, 32>}, {pipeline_mode = #tpu.pipeline_mode<synchronous>, transform_indices = @transform_6, window_bounds = array<i64: 1, 32>}, {transform_indices = @transform_7, window_bounds = array<i64: 64, 32>}]} {
    %c0 = arith.constant 0 : index
    %c0_0 = arith.constant 0 : index
    %0 = vector.load %arg1[%c0, %c0_0] : memref<64x8xf32, #tpu.memory_space<vmem>>, vector<64x8xf32>
    %c0_1 = arith.constant 0 : index
    %c0_2 = arith.constant 0 : index
    %1 = vector.load %arg3[%c0_1, %c0_2] : memref<8x16xf32, #tpu.memory_space<vmem>>, vector<8x16xf32>
    %cst = arith.constant dense<0.000000e+00> : vector<64x16xf32>
    %2 = tpu.matmul %0, %1, %cst {dimension_numbers = #tpu.dot_dimension_numbers<[1], [0], [0], [1], [0, 0, 1, 1], [], []>} : vector<64x8xf32>, vector<8x16xf32>, vector<64x16xf32> -> vector<64x16xf32>
    %c0_3 = arith.constant 0 : index
    %c0_4 = arith.constant 0 : index
    %3 = vector.load %arg4[%c0_3, %c0_4] : memref<1x16xf32, #tpu.memory_space<vmem>>, vector<1x16xf32>
    %4 = vector.broadcast %3 : vector<1x16xf32> to vector<64x16xf32>
    %5 = arith.addf %2, %4 : vector<64x16xf32>
    %cst_5 = arith.constant 0.000000e+00 : f32
    %6 = vector.broadcast %cst_5 : f32 to vector<64x16xf32>
    %7 = arith.maximumf %5, %6 : vector<64x16xf32>
    %c0_6 = arith.constant 0 : index
    %c0_7 = arith.constant 0 : index
    %8 = vector.load %arg2[%c0_6, %c0_7] : memref<64x16xf32, #tpu.memory_space<vmem>>, vector<64x16xf32>
    %c0_8 = arith.constant 0 : index
    %c0_9 = arith.constant 0 : index
    %9 = vector.load %arg6[%c0_8, %c0_9] : memref<16x32xf32, #tpu.memory_space<vmem>>, vector<16x32xf32>
    %cst_10 = arith.constant dense<0.000000e+00> : vector<64x32xf32>
    %10 = tpu.matmul %8, %9, %cst_10 {dimension_numbers = #tpu.dot_dimension_numbers<[1], [0], [0], [1], [0, 0, 1, 1], [], []>} : vector<64x16xf32>, vector<16x32xf32>, vector<64x32xf32> -> vector<64x32xf32>
    %c0_11 = arith.constant 0 : index
    %c0_12 = arith.constant 0 : index
    %11 = vector.load %arg5[%c0_11, %c0_12] : memref<16x32xf32, #tpu.memory_space<vmem>>, vector<16x32xf32>
    %cst_13 = arith.constant dense<0.000000e+00> : vector<64x32xf32>
    %12 = tpu.matmul %7, %11, %cst_13 {dimension_numbers = #tpu.dot_dimension_numbers<[1], [0], [0], [1], [0, 0, 1, 1], [], []>} : vector<64x16xf32>, vector<16x32xf32>, vector<64x32xf32> -> vector<64x32xf32>
    %13 = arith.addf %10, %12 : vector<64x32xf32>
    %c0_14 = arith.constant 0 : index
    %c0_15 = arith.constant 0 : index
    %14 = vector.load %arg7[%c0_14, %c0_15] : memref<1x32xf32, #tpu.memory_space<vmem>>, vector<1x32xf32>
    %15 = vector.broadcast %14 : vector<1x32xf32> to vector<64x32xf32>
    %16 = arith.addf %13, %15 : vector<64x32xf32>
    %17 = tpu.iota {dimensions = array<i32: 1>} : vector<64x32xi32>
    %c24_i32 = arith.constant 24 : i32
    %18 = vector.broadcast %c24_i32 : i32 to vector<64x32xi32>
    %19 = arith.cmpi sge, %17, %18 : vector<64x32xi32>
    %cst_16 = arith.constant 0.000000e+00 : f32
    %20 = vector.broadcast %cst_16 : f32 to vector<64x32xf32>
    %21 = arith.maximumf %16, %20 : vector<64x32xf32>
    %22 = arith.select %19, %21, %16 : vector<64x32xi1>, vector<64x32xf32>
    %c0_17 = arith.constant 0 : index
    %c0_18 = arith.constant 0 : index
    %23 = vector.load %arg8[%c0_17, %c0_18] : memref<64x32xf32, #tpu.memory_space<vmem>>, vector<64x32xf32>
    tpu.vector_store %arg8[%c0_17, %c0_18], %22 {strides = array<i32>} : memref<64x32xf32, #tpu.memory_space<vmem>>, vector<64x32xf32>,
    return
  }
  func.func @transform_0(%arg0: i32) -> (i32, i32) {
    %c0_i32 = arith.constant 0 : i32
    %c0_i32_0 = arith.constant 0 : i32
    return %arg0, %c0_i32 : i32, i32
  }
  func.func @transform_1(%arg0: i32) -> (i32, i32) {
    %c0_i32 = arith.constant 0 : i32
    %c0_i32_0 = arith.constant 0 : i32
    return %arg0, %c0_i32 : i32, i32
  }
  func.func @transform_2(%arg0: i32) -> (i32, i32) {
    %c0_i32 = arith.constant 0 : i32
    %c0_i32_0 = arith.constant 0 : i32
    %c0_i32_1 = arith.constant 0 : i32
    return %c0_i32, %c0_i32_0 : i32, i32
  }
  func.func @transform_3(%arg0: i32) -> (i32, i32) {
    %c0_i32 = arith.constant 0 : i32
    %c0_i32_0 = arith.constant 0 : i32
    %c0_i32_1 = arith.constant 0 : i32
    return %c0_i32, %c0_i32_0 : i32, i32
  }
  func.func @transform_4(%arg0: i32) -> (i32, i32) {
    %c0_i32 = arith.constant 0 : i32
    %c0_i32_0 = arith.constant 0 : i32
    %c0_i32_1 = arith.constant 0 : i32
    return %c0_i32, %c0_i32_0 : i32, i32
  }
  func.func @transform_5(%arg0: i32) -> (i32, i32) {
    %c0_i32 = arith.constant 0 : i32
    %c0_i32_0 = arith.constant 0 : i32
    %c0_i32_1 = arith.constant 0 : i32
    return %c0_i32, %c0_i32_0 : i32, i32
  }
  func.func @transform_6(%arg0: i32) -> (i32, i32) {
    %c0_i32 = arith.constant 0 : i32
    %c0_i32_0 = arith.constant 0 : i32
    %c0_i32_1 = arith.constant 0 : i32
    return %c0_i32, %c0_i32_0 : i32, i32
  }
  func.func @transform_7(%arg0: i32) -> (i32, i32) {
    %c0_i32 = arith.constant 0 : i32
    %c0_i32_0 = arith.constant 0 : i32
    return %arg0, %c0_i32 : i32, i32
  }
}

</mosaic_0001>

<bundles_post_ra>
// kernel: tpu_custom_call.1
= control target key start
LH: loop header
LB: loop body
LE: loop exit
PB: predicated region body
PF: predicated region fallthrough
CT: control target
= control target key end

     0   :  { %vm42_vm0 = vcmask 64512   ;;  %vm192_vm1 = vcmask 130048   ;;  %v466_v52 = vlaneseq  ;;  %vm485_vm3 = vcmask 261120   ;;  %s790_s2 = inlined_call_operand.vmem [shape: f32[8,16], index: 2, kind: input, shape index: {}]   ;;  %s791_s0 = inlined_call_operand.vmem [shape: f32[64,8], index: 0, kind: input, shape index: {}]   ;;  %s792_s4 = inlined_call_operand.vmem [shape: f32[16,32], index: 4, kind: input, shape index: {}]   ;;  %s793_s5 = inlined_call_operand.vmem [shape: f32[16,32], index: 5, kind: input, shape index: {}]   ;;  %s794_s3 = inlined_call_operand.vmem [shape: f32[1,16], index: 3, kind: input, shape index: {}]   ;;  %s795_s1 = inlined_call_operand.vmem [shape: f32[64,16], index: 1, kind: input, shape index: {}]   ;;  %s796_s6 = inlined_call_operand.vmem [shape: f32[1,32], index: 6, kind: input, shape index: {}]   ;;  %s797_s7 = inlined_call_operand.vmem [shape: f32[64,32], index: 7, kind: output, shape index: {}]  }
   0x1   :  { %v34_v0 = vld [vmem:[%s790_s2] sm:$0xff]  ;;  %v27_v2 = vld [vmem:[%s791_s0 + $0x8] sm:$0xff]  ;;  %v28_v3 = vld [vmem:[%s791_s0 + $0x10] sm:$0xff] }
   0x2   :  { %v26_v1 = vld [vmem:[%s791_s0] sm:$0xff]  ;;  %553 = vmatprep.subr.mxu0 %v34_v0  ;;  %v29_v4 = vld [vmem:[%s791_s0 + $0x18] sm:$0xff]  ;;  %v31_v6 = vld [vmem:[%s791_s0 + $0x28] sm:$0xff]  ;;  %v467_v55 = vand.u32 127, %v466_v52 }
   0x3   :  { %555 = vmatprep.mubr.msk.f32.mxu0 %vm42_vm0, %v26_v1  ;;  %554 = vmatpush3.msra.mxu0 %v34_v0  ;;  %v30_v5 = vld [vmem:[%s791_s0 + $0x20] sm:$0xff]  ;;  %v32_v7 = vld [vmem:[%s791_s0 + $0x30] sm:$0xff]  ;;  %v33_v8 = vld [vmem:[%s791_s0 + $0x38] sm:$0xff] }
   0x4   :  { %556 = vmatmul.mubr.msk.f32.vlgmr.msra.gmra.mrb[0].mxu0 %vm42_vm0, %v27_v2  ;;  %v190_v9 = vld [vmem:[%s792_s4] sm:$0xff]  ;;  %v191_v10 = vld [vmem:[%s792_s4 + $0x8] sm:$0xff]  ;;  %v182_v42 = vld [vmem:[%s795_s1 + $0x10] sm:$0xff]  ;;  %vm468_vm2 = vcmp.ge.s32.totalorder %v467_v55, 24 }
   0x5   :  { %558 = vmatprep.mubr.msk.f32.mxu0 %vm42_vm0, %v28_v3  ;;  %v599_v11 = vpack.c.bf16 %v191_v10, %v190_v9  ;;  %v188_v12 = vld [vmem:[%s793_s5] sm:$0xff]  ;;  %v189_v13 = vld [vmem:[%s793_s5 + $0x8] sm:$0xff]  ;;  %v183_v43 = vld [vmem:[%s795_s1 + $0x18] sm:$0xff] }
   0x6   :  { %v603_v14 = vpack.c.bf16 %v189_v13, %v188_v12  ;;  %v498_v15 = vld [vmem:[%s794_s3] ss:$0 sm:$0xff]  ;;  %v181_v41 = vld [vmem:[%s795_s1 + $0x8] sm:$0xff]  ;;  %v186_v46 = vld [vmem:[%s795_s1 + $0x30] sm:$0xff] }
   0x7   :  { %600 = vmatprep.subr.bf16.mxu0 %v599_v11  ;;  %607 = vmatprep.subr.bf16.mxu1 %v599_v11  ;;  %v180_v40 = vld [vmem:[%s795_s1] sm:$0xff]  ;;  %v185_v45 = vld [vmem:[%s795_s1 + $0x28] sm:$0xff]  ;;  %v187_v47 = vld [vmem:[%s795_s1 + $0x38] sm:$0xff] }
   0x8   :  { %559 = vmatmul.mubr.msk.f32.gmra.mrb[2].mxu0 %vm42_vm0, %v29_v4  ;;  %608 = vmatpush3.bf16.msra.mxu1 %v599_v11  ;;  %v184_v44 = vld [vmem:[%s795_s1 + $0x20] sm:$0xff] }
   0x9   :  { %561 = vmatprep.mubr.msk.f32.mxu0 %vm42_vm0, %v30_v5  ;;  %602 = vmatpush3.bf16.msra.mxu0 %v599_v11  ;;  %v523_v54 = vld [vmem:[%s796_s6] ss:$0 sm:$0xff] }
   0xa   :  { %604 = vmatprep.subr.bf16.mxu1 %v603_v14 }
   0xc   :  { %562 = vmatmul.mubr.msk.f32.gmra.mrb[4].mxu0 %vm42_vm0, %v31_v6 }
   0xd   :  { %564 = vmatprep.mubr.msk.f32.mxu0 %vm42_vm0, %v32_v7 }
  0x10   :  { %565 = vmatmul.mubr.msk.f32.gmra.mrb[6].mxu0 %vm42_vm0, %v33_v8 }
  0xd7   :  { %v557_v16 = vpop.f32.mrb[0].mxu0 }
  0xd8   :  { %v139_v17 = vadd.f32 %v557_v16, %v498_v15  ;;  %v133_v18 = vpop.f32.mrb[1].mxu0 }
  0xd9   :  { %v134_v19 = vadd.f32 %v498_v15, %v133_v18 }
  0xda   :  { %v173_v22 = vmax.f32 %v139_v17, 0.0 }
  0xdb   :  { %v172_v20 = vmax.f32 %v134_v19, 0.0  ;;  %v560_v21 = vpop.f32.mrb[2].mxu0 }
  0xdc   :  { %v149_v23 = vadd.f32 %v560_v21, %v498_v15  ;;  %v143_v24 = vpop.f32.mrb[3].mxu0 }
  0xdd   :  { %v144_v25 = vadd.f32 %v498_v15, %v143_v24  ;;  %571 = vmatprep.mubr.msk.f32.mxu0 %vm192_vm1, %v172_v20 }
  0xde   :  { %572 = vmatmul.mubr.msk.f32.vlgmr.msra.gmra.mrb[8].mxu0 %vm192_vm1, %v173_v22  ;;  %v175_v28 = vmax.f32 %v149_v23, 0.0 }
  0xdf   :  { %v174_v26 = vmax.f32 %v144_v25, 0.0  ;;  %v563_v27 = vpop.f32.mrb[4].mxu0 }
  0xe0   :  { %v159_v29 = vadd.f32 %v563_v27, %v498_v15  ;;  %v153_v30 = vpop.f32.mrb[5].mxu0 }
  0xe1   :  { %v154_v31 = vadd.f32 %v498_v15, %v153_v30  ;;  %574 = vmatprep.mubr.msk.f32.mxu0 %vm192_vm1, %v174_v26 }
  0xe2   :  { %575 = vmatmul.mubr.msk.f32.gmra.mrb[10].mxu0 %vm192_vm1, %v175_v28  ;;  %v177_v34 = vmax.f32 %v159_v29, 0.0 }
  0xe3   :  { %v176_v32 = vmax.f32 %v154_v31, 0.0  ;;  %v566_v33 = vpop.f32.mrb[6].mxu0 }
  0xe4   :  { %v169_v35 = vadd.f32 %v566_v33, %v498_v15  ;;  %v163_v36 = vpop.f32.mrb[7].mxu0 }
  0xe5   :  { %v164_v37 = vadd.f32 %v498_v15, %v163_v36  ;;  %577 = vmatprep.mubr.msk.f32.mxu1 %vm192_vm1, %v176_v32 }
  0xe6   :  { %578 = vmatmul.mubr.msk.f32.vlgmr.msra.gmra.mrb[0].mxu1 %vm192_vm1, %v177_v34  ;;  %v179_v39 = vmax.f32 %v169_v35, 0.0 }
  0xe7   :  { %v178_v38 = vmax.f32 %v164_v37, 0.0  ;;  %606 = vmatpush3.bf16.msra.mxu1 %v603_v14 }
  0xe9   :  { %580 = vmatprep.mubr.msk.f32.mxu1 %vm192_vm1, %v178_v38 }
  0xea   :  { %581 = vmatmul.mubr.msk.f32.gmra.mrb[2].mxu1 %vm192_vm1, %v179_v39 }
  0xeb   :  { %587 = vmatprep.mubr.msk.f32.mxu1 %vm192_vm1, %v180_v40 }
  0xee   :  { %588 = vmatmul.mubr.msk.f32.vlgmr.msra.gmra.mrb[4].mxu1 %vm192_vm1, %v181_v41 }
  0xef   :  { %590 = vmatprep.mubr.msk.f32.mxu1 %vm192_vm1, %v182_v42 }
  0xf2   :  { %591 = vmatmul.mubr.msk.f32.gmra.mrb[6].mxu1 %vm192_vm1, %v183_v43 }
  0xf3   :  { %593 = vmatprep.mubr.msk.f32.mxu1 %vm192_vm1, %v184_v44 }
  0xf6   :  { %594 = vmatmul.mubr.msk.f32.gmra.mrb[0].mxu1 %vm192_vm1, %v185_v45 }
  0xf7   :  { %596 = vmatprep.mubr.msk.f32.mxu1 %vm192_vm1, %v186_v46 }
  0xfa   :  { %597 = vmatmul.mubr.msk.f32.gmra.mrb[2].mxu1 %vm192_vm1, %v187_v47 }
 0x1b1   :  { %v573_v48 = vpop.f32.mrb[8].mxu0 }
 0x1b2   :  { %v283_v49 = vpop.f32.mrb[9].mxu0 }
 0x1b5   :  { %v576_v50 = vpop.f32.mrb[10].mxu0 }
 0x1b6   :  { %v293_v51 = vpop.f32.mrb[11].mxu0 }
 0x1c1   :  { %v589_v53 = vpop.f32.mrb[4].mxu1 }
 0x1c2   :  { %v418_v56 = vadd.f32 %v589_v53, %v573_v48  ;;  %v412_v57 = vpop.f32.mrb[5].mxu1 }
 0x1c3   :  { %v413_v58 = vadd.f32 %v412_v57, %v283_v49 }
 0x1c4   :  { %v459_v59 = vadd.f32 %v523_v54, %v418_v56 }
 0x1c5   :  { %v458_v60 = vadd.f32 %v523_v54, %v413_v58  ;;  %v592_v61 = vpop.f32.mrb[6].mxu1 }
 0x1c6   :  { %v470_v62 = vmax.f32 %v459_v59, 0.0  ;;  %v428_v63 = vadd.f32 %v592_v61, %v576_v50  ;;  %v422_v0 = vpop.f32.mrb[7].mxu1 }
 0x1c7   :  { %v469_v1 = vmax.f32 %v458_v60, 0.0  ;;  %v423_v2 = vadd.f32 %v422_v0, %v293_v51 }
 0x1c8   :  { %v478_v3 = vsel %vm468_vm2, %v470_v62, %v459_v59  ;;  %v461_v4 = vadd.f32 %v523_v54, %v428_v63 }
 0x1c9   :  { %487 = vst.msk [vmem:[%s797_s7 + $0x8] sm:$0xff] %vm485_vm3, %v478_v3  ;;  %v477_v5 = vsel %vm468_vm2, %v469_v1, %v458_v60  ;;  %v460_v6 = vadd.f32 %v523_v54, %v423_v2  ;;  %v595_v7 = vpop.f32.mrb[0].mxu1 }
 0x1ca   :  { %486 = vst.msk [vmem:[%s797_s7] sm:$0xff] %vm485_vm3, %v477_v5  ;;  %v472_v8 = vmax.f32 %v461_v4, 0.0  ;;  %v463_v9 = vadd.f32 %v595_v7, %v523_v54  ;;  %v432_v10 = vpop.f32.mrb[1].mxu1 }
 0x1cb   :  { %v471_v11 = vmax.f32 %v460_v6, 0.0  ;;  %v462_v12 = vadd.f32 %v523_v54, %v432_v10 }
 0x1cc   :  { %v480_v13 = vsel %vm468_vm2, %v472_v8, %v461_v4  ;;  %v474_v14 = vmax.f32 %v463_v9, 0.0 }
 0x1cd   :  { %489 = vst.msk [vmem:[%s797_s7 + $0x18] sm:$0xff] %vm485_vm3, %v480_v13  ;;  %v479_v15 = vsel %vm468_vm2, %v471_v11, %v460_v6  ;;  %v473_v16 = vmax.f32 %v462_v12, 0.0  ;;  %v598_v17 = vpop.f32.mrb[2].mxu1 }
 0x1ce   :  { %488 = vst.msk [vmem:[%s797_s7 + $0x10] sm:$0xff] %vm485_vm3, %v479_v15  ;;  %v482_v18 = vsel %vm468_vm2, %v474_v14, %v463_v9  ;;  %v465_v19 = vadd.f32 %v598_v17, %v523_v54  ;;  %v442_v20 = vpop.f32.mrb[3].mxu1 }
 0x1cf   :  { %491 = vst.msk [vmem:[%s797_s7 + $0x28] sm:$0xff] %vm485_vm3, %v482_v18  ;;  %v481_v21 = vsel %vm468_vm2, %v473_v16, %v462_v12  ;;  %v464_v22 = vadd.f32 %v523_v54, %v442_v20 }
 0x1d0   :  { %490 = vst.msk [vmem:[%s797_s7 + $0x20] sm:$0xff] %vm485_vm3, %v481_v21  ;;  %v476_v23 = vmax.f32 %v465_v19, 0.0 }
 0x1d1   :  { %v475_v24 = vmax.f32 %v464_v22, 0.0 }
 0x1d2   :  { %v484_v25 = vsel %vm468_vm2, %v476_v23, %v465_v19 }
 0x1d3   :  { %493 = vst.msk [vmem:[%s797_s7 + $0x38] sm:$0xff] %vm485_vm3, %v484_v25  ;;  %v483_v26 = vsel %vm468_vm2, %v475_v24, %v464_v22 }
 0x1d4   :  { %492 = vst.msk [vmem:[%s797_s7 + $0x30] sm:$0xff] %vm485_vm3, %v483_v26 }

</bundles_post_ra>
